<compile_context>
chip_gen: v7x
topology: tpu7x:2x2x1
jax: 0.10.0
libtpu: 0.0.40
codegen_flags: <defaults>
</compile_context>

<pallas_src>
import jax
import jax.numpy as jnp
from jax import lax
from jax.experimental import pallas as pl
from jax.experimental.pallas import tpu as pltpu

_EPS = 1e-12  # matches torch.nn.functional.normalize default eps


def _binary_cosine_kernel(x_ref, w_ref, out_ref):
    x = x_ref[...].astype(jnp.float32)  # (B, D)
    w = w_ref[...].astype(jnp.float32)  # (C, D), C == 1 for this module

    # Raw dot products on the MXU, contracting the feature axis of both
    # operands (bd,cd->bc). No transpose is materialized.
    s = lax.dot_general(
        x, w,
        dimension_numbers=(((1,), (1,)), ((), ())),
        preferred_element_type=jnp.float32,
    )  # (B, C)

    # Post-matmul L2 normalization: divide by max(||v||, eps) for each row of
    # x and w, expressed as rsqrt(max(||v||^2, eps^2)) multiplies.
    sumsq_x = jnp.sum(x * x, axis=-1, keepdims=True)            # (B, 1)
    sumsq_w = jnp.sum(w * w, axis=-1, keepdims=True)            # (C, 1)
    inv_x = lax.rsqrt(jnp.maximum(sumsq_x, _EPS * _EPS))        # (B, 1)
    inv_w = lax.rsqrt(jnp.maximum(sumsq_w, _EPS * _EPS))        # (C, 1)

    out_ref[...] = (s * inv_x * inv_w.T).astype(out_ref.dtype)  # (B, C)


@jax.jit
def binary_cosine_classifier_forward(x, weight):
    """x: (B, D) float32, weight: (C, D) float32 (C == 1) -> {'logits': (B, C)}."""
    B, D = x.shape
    C, D2 = weight.shape
    assert D == D2

    logits = pl.pallas_call(
        _binary_cosine_kernel,
        out_shape=jax.ShapeDtypeStruct((B, C), jnp.float32),
        in_specs=[
            pl.BlockSpec(memory_space=pltpu.MemorySpace.VMEM),
            pl.BlockSpec(memory_space=pltpu.MemorySpace.VMEM),
        ],
        out_specs=pl.BlockSpec(memory_space=pltpu.MemorySpace.VMEM),
    )(x, weight)

    return {"logits": logits}


def _reference(x, weight):
    x_n = x / jnp.maximum(jnp.linalg.norm(x, axis=-1, keepdims=True), _EPS)
    w_n = weight / jnp.maximum(
        jnp.linalg.norm(weight, axis=-1, keepdims=True), _EPS
    )
    return x_n @ w_n.T


if __name__ == "__main__":
    key = jax.random.PRNGKey(0)
    k_x, k_w = jax.random.split(key)

    batch = 8
    features_dim = 32

    # Features coming out of a backbone.
    x = jax.random.normal(k_x, (batch, features_dim), dtype=jnp.float32)

    # nn.Parameter(torch.randn(1, features_dim)) then
    # kaiming_normal_(nonlinearity='linear') -> N(0, 1/fan_in), fan_in = D.
    weight = jax.random.normal(
        k_w, (1, features_dim), dtype=jnp.float32
    ) * (1.0 / jnp.sqrt(features_dim))

    out = binary_cosine_classifier_forward(x, weight)
    logits = jax.block_until_ready(out["logits"])

    ref = _reference(x, weight)
    assert logits.shape == (batch, 1)
    assert jnp.allclose(logits, ref, atol=1e-5, rtol=1e-5), "mismatch vs reference"

    print("KERNEL_OK")
</pallas_src>

<mosaic_0001>
module attributes {stable_mosaic.version = 11 : i64} {
  func.func @_binary_cosine_kernel(%arg0: memref<8x32xf32, #tpu.memory_space<vmem>>, %arg1: memref<1x32xf32, #tpu.memory_space<vmem>>, %arg2: memref<8x1xf32, #tpu.memory_space<vmem>>) attributes {dimension_semantics = [], scalar_prefetch = 0 : i64, scratch_operands = 0 : i64, tpu.core_type = #tpu.core_type<tc>} {
    %c0 = arith.constant 0 : index
    %c0_0 = arith.constant 0 : index
    %0 = vector.load %arg0[%c0, %c0_0] : memref<8x32xf32, #tpu.memory_space<vmem>>, vector<8x32xf32>
    %c0_1 = arith.constant 0 : index
    %c0_2 = arith.constant 0 : index
    %1 = vector.load %arg1[%c0_1, %c0_2] : memref<1x32xf32, #tpu.memory_space<vmem>>, vector<1x32xf32>
    %cst = arith.constant dense<0.000000e+00> : vector<8x1xf32>
    %2 = tpu.matmul %0, %1, %cst {dimension_numbers = #tpu.dot_dimension_numbers<[1], [1], [0], [0], [0, 0, 1, 0], [], []>} : vector<8x32xf32>, vector<1x32xf32>, vector<8x1xf32> -> vector<8x1xf32>
    %3 = arith.mulf %0, %0 : vector<8x32xf32>
    %cst_3 = arith.constant dense<0.000000e+00> : vector<8xf32>
    %4 = vector.multi_reduction <add>, %3, %cst_3 [1] : vector<8x32xf32> to vector<8xf32>
    %5 = vector.shape_cast %4 : vector<8xf32> to vector<8x1xf32>
    %6 = arith.mulf %1, %1 : vector<1x32xf32>
    %cst_4 = arith.constant dense<0.000000e+00> : vector<1xf32>
    %7 = vector.multi_reduction <add>, %6, %cst_4 [1] : vector<1x32xf32> to vector<1xf32>
    %8 = vector.shape_cast %7 : vector<1xf32> to vector<1x1xf32>
    %cst_5 = arith.constant 1.000000e-24 : f32
    %9 = vector.broadcast %cst_5 : f32 to vector<8x1xf32>
    %10 = arith.maximumf %5, %9 : vector<8x1xf32>
    %11 = math.rsqrt %10 : vector<8x1xf32>
    %cst_6 = arith.constant 1.000000e-24 : f32
    %12 = vector.broadcast %cst_6 : f32 to vector<1x1xf32>
    %13 = arith.maximumf %8, %12 : vector<1x1xf32>
    %14 = math.rsqrt %13 : vector<1x1xf32>
    %15 = arith.mulf %2, %11 : vector<8x1xf32>
    %16 = tpu.transpose %14, [1, 0] : vector<1x1xf32> -> vector<1x1xf32>
    %17 = vector.broadcast %16 : vector<1x1xf32> to vector<8x1xf32>
    %18 = arith.mulf %15, %17 : vector<8x1xf32>
    %c0_7 = arith.constant 0 : index
    %c0_8 = arith.constant 0 : index
    %19 = vector.load %arg2[%c0_7, %c0_8] : memref<8x1xf32, #tpu.memory_space<vmem>>, vector<8x1xf32>
    tpu.vector_store %arg2[%c0_7, %c0_8], %18 {strides = array<i32>} : memref<8x1xf32, #tpu.memory_space<vmem>>, vector<8x1xf32>,
    return
  }
}

</mosaic_0001>

<bundles_post_ra>
// kernel: binary_cosine_classifier_forward.1
= control target key start
LH: loop header
LB: loop body
LE: loop exit
PB: predicated region body
PF: predicated region fallthrough
CT: control target
= control target key end

     0   :  { %7 = vsyncpa [#allocation3], 0  ;;  %s124_s9 = smov [#allocation2]   ;;  %s158_s0 = inlined_call_operand.hbm [shape: f32[8,32], index: 0, kind: input, shape index: {}]   ;;  %s159_s1 = inlined_call_operand.vmem [shape: f32[1,32], index: 1, kind: input, shape index: {}]   ;;  %s160_s2 = inlined_call_operand.vmem [shape: f32[8,1], index: 2, kind: output, shape index: {}]  }
   0x1   :  { %s14_s10 = sshll.u32 %s124_s9, 4  ;;  %s100_s13 = scalar_lea.hbm %s158_s0, 128  ;;  %s15_s10 = int_to_ptr.vmem [resolvable:$true] %s14_s10 }
   0x2   :  { %p101_p0 = scmp.ne.s32.totalorder %s158_s0, %s100_s13  ;;  %p104_p1 = scmp.lt.u32.totalorder %s100_s13, %s158_s0 }
   0x4   :  { %p106_p2 = pnand %p104_p1, %p101_p0 }
   0x6   :  { %109 = shalt.err (!%p106_p2)
}
   0x7   :  { %s110_s18 = scalar_lea.vmem %s15_s10, 128  ;;  %p115_p4 = scmp.lt.s32.totalorder %s15_s10, %s15_s10 }
   0x8   :  { %p111_p3 = scmp.ne.s32.totalorder %s15_s10, %s110_s18  ;;  %p116_p5 = scmp.lt.s32.totalorder %s110_s18, %s110_s18 }
   0xa   :  { %p117_p6 = por %p116_p5, %p115_p4 }
   0xc   :  { %p118_p7 = pnand %p117_p6, %p111_p3 }
   0xe   :  { %121 = shalt.err (!%p118_p7)
}
   0xf   :  { %17 = dma.hbm_to_vmem [thread:$0]  %s158_s0, 128, %s15_s10, [#allocation3]  }
  0x10   :  { %122 = dma.done.wait [#allocation3], 128  }
  0x11   :  { %123 = vsyncadd [#allocation3], 4294967168  ;;  %v26_v0 = vlaneseq  ;;  %v24_v3 = vld [vmem:[%s159_s1] sm:$0x1]  ;;  %vm41_vm0 = vcmask 253952   ;;  %vm32_vm1 = vcmask 261120  }
  0x12   :  { %v23_v4 = vld [vmem:[#allocation2] sm:$0xff]  ;;  %v40_v5 = vmul.f32 %v24_v3, %v24_v3  ;;  %vm87_vm2 = vcmask 7168  }
  0x13   :  { %v27_v1 = vshrl.u32 %v26_v0, 7  ;;  %v36_v6 = vmul.f32 %v23_v4, %v23_v4 }
  0x14   :  { %v42_v8 = vsel %vm41_vm0, %v40_v5, 0.0 }
  0x15   :  { %v28_v2 = vsub.s32 0, %v27_v1  ;;  %43 = vadd.xlane.f32.xlu0 %v42_v8  ;;  %v37_v10 = vsel %vm32_vm1, %v36_v6, 0.0 }
  0x17   :  { %v29_v7 = vrot.slane %v24_v3, %v28_v2 }
  0x19   :  { %v31_v9 = vmul.f32 %v29_v7, %v23_v4  ;;  %38 = vadd.xlane.f32.xlu0 %v37_v10 }
  0x1b   :  { %v33_v11 = vsel %vm32_vm1, %v31_v9, 0.0 }
  0x1c   :  { %34 = vadd.xlane.f32.xlu1 %v33_v11 }
  0xa2   :  { %v44_v12 = vpop.xlane.xlu0 %43 }
  0xa3   :  { %v47_v13 = vmax.f32 %v44_v12, 1e-24 }
  0xa5   :  { %96 = vrsqrt.f32 %v47_v13 }
  0xa6   :  { %v39_v15 = vpop.xlane.xlu0 %38 }
  0xa7   :  { %v45_v16 = vmax.f32 %v39_v15, 1e-24 }
  0xa9   :  { %98 = vrsqrt.f32 %v45_v16  ;;  %v35_v17 = vpop.xlane.xlu1 %34 }
  0xaf   :  { %v97_v14 = vpop.eup %96 }
  0xb0   :  { %50 = vxpose.xlu1.b32.start.end [1/1] (short) (narrow) %v97_v14, 8 }
  0xb3   :  { %v99_v18 = vpop.eup %98 }
  0xb4   :  { %v49_v20 = vmul.f32 %v99_v18, %v35_v17 }
 0x130   :  { %v66_v19 = vpop.trf.xlu1 }
 0x131   :  { %v85_v21 = vrot.slane %v66_v19, %v28_v2 }
 0x133   :  { %v86_v22 = vmul.f32 %v85_v21, %v49_v20 }
 0x135   :  { %88 = vst.msk [vmem:[%s160_s2] sm:$0xff] %vm87_vm2, %v86_v22 }
 0x136   :  { %93 = vsyncpa [#allocation3], 1 }

</bundles_post_ra>
